<compile_context>
chip_gen: v6e
topology: v6e:2x2x1
jax: 0.10.0
libtpu: 0.0.40
codegen_flags: <defaults>
</compile_context>

<pallas_src>
import jax
import jax.numpy as jnp
from jax.experimental import pallas as pl
from jax.experimental.pallas import tpu as pltpu

LANE = 128
_TARGET_BLOCK_BYTES = 2 * 1024 * 1024   # ~2 MiB per block -> ~85%+ HBM roofline
_MIN_PALLAS_BYTES = 64 * 1024           # below this, launch/layout overhead dominates


def _round_up(a, b):
    return -(-a // b) * b


def _sublane_mult(*dtypes):
    # 8 rows for 4-byte, 16 for 2-byte, 32 for 1-byte dtypes (sublane packing).
    min_itemsize = min(jnp.dtype(d).itemsize for d in dtypes)
    return max(8, 32 // max(1, min_itemsize))


def _make_lambda_kernel(lambd):
    """Pallas kernel body applying `lambd` elementwise on the current tile."""

    def kernel(x_ref, o_ref):
        o_ref[...] = lambd(x_ref[...]).astype(o_ref.dtype)

    return kernel


class LambdaLayer:
    """Pallas equivalent of the PyTorch LambdaLayer module: forward(x) = lambd(x)."""

    def __init__(self, lambd, *, min_pallas_bytes=_MIN_PALLAS_BYTES):
        self.lambd = lambd
        self.min_pallas_bytes = min_pallas_bytes
        self._kernel = _make_lambda_kernel(lambd)

    def __call__(self, x):
        x = jnp.asarray(x)

        # Derive the output aval; fall back to plain JAX for anything that is
        # not a shape-preserving, traceable, single-array elementwise lambda.
        try:
            out_aval = jax.eval_shape(
                self.lambd, jax.ShapeDtypeStruct(x.shape, x.dtype))
        except Exception:
            return self.lambd(x)
        if not hasattr(out_aval, "shape") or out_aval.shape != x.shape:
            # TODO(synk): shape-changing / non-elementwise lambd has no generic
            # tiled Pallas form; run it as plain JAX.
            return self.lambd(x)
        out_dtype = out_aval.dtype

        n = x.size
        in_itemsize = jnp.dtype(x.dtype).itemsize
        out_itemsize = jnp.dtype(out_dtype).itemsize
        if n == 0 or n * in_itemsize < self.min_pallas_bytes:
            # Tiny tensors: plain XLA fuses this for free; skip the kernel.
            return self.lambd(x)

        sub = _sublane_mult(x.dtype, out_dtype)

        # Lane padding only (up to a multiple of 128 elements).  The common
        # 128-aligned case takes the zero-copy reshape path (no pad, no slice).
        n_lane = _round_up(n, LANE)
        padded = n_lane != n
        rows = n_lane // LANE
        if padded:
            # Pad with ones (not zeros) so lambdas like 1/x or log(x) do not
            # produce inf/NaN in the (discarded) tail.
            flat = jnp.pad(x.reshape(-1), (0, n_lane - n), constant_values=1)
            slab = flat.reshape(rows, LANE)
        else:
            slab = x.reshape(rows, LANE)

        # Block sizing: ~2 MiB per block, sublane-aligned, and at least 2 grid
        # steps when possible so v7x's second TensorCore gets half the stream.
        big_itemsize = max(in_itemsize, out_itemsize)
        max_tile = max(sub,
                       (_TARGET_BLOCK_BYTES // (LANE * big_itemsize)) // sub * sub)
        if rows <= sub:
            tile_rows = rows                      # single full-extent block
        else:
            half = _round_up(-(-rows // 2), sub)  # ceil(rows/2) rounded to sublanes
            tile_rows = max(sub, min(max_tile, half))
        grid = (pl.cdiv(rows, tile_rows),)

        extra_kwargs = {}
        if padded and out_dtype == x.dtype:
            # The padded slab is a private temporary -> safe to donate it.
            extra_kwargs["input_output_aliases"] = {0: 0}

        out = pl.pallas_call(
            self._kernel,
            out_shape=jax.ShapeDtypeStruct((rows, LANE), out_dtype),
            grid_spec=pltpu.PrefetchScalarGridSpec(
                num_scalar_prefetch=0,
                grid=grid,
                in_specs=[pl.BlockSpec((tile_rows, LANE), lambda i: (i, 0))],
                out_specs=pl.BlockSpec((tile_rows, LANE), lambda i: (i, 0)),
            ),
            compiler_params=pltpu.CompilerParams(
                dimension_semantics=("parallel",),
            ),
            cost_estimate=pl.CostEstimate(
                flops=n,
                transcendentals=0,
                bytes_accessed=n_lane * (in_itemsize + out_itemsize),
            ),
            **extra_kwargs,
        )(slab)

        if padded:
            return out.reshape(-1)[:n].reshape(x.shape)
        return out.reshape(x.shape)


if __name__ == "__main__":
    key = jax.random.PRNGKey(0)
    lambd = lambda t: t * 2.0

    # Small NCHW input consistent with the VAE usage: takes the fast bypass.
    x_small = jax.random.normal(key, (2, 4, 16, 16), dtype=jnp.float32)
    layer = LambdaLayer(lambd)
    y_small = jax.block_until_ready(layer(x_small))
    assert y_small.shape == x_small.shape and y_small.dtype == x_small.dtype
    assert jnp.allclose(y_small, lambd(x_small), atol=1e-6, rtol=1e-6)

    # Larger 128-aligned input: Pallas streaming path (no pad, no slice).
    k1, k2 = jax.random.split(key)
    x_big = jax.random.normal(k1, (4, 8, 64, 64), dtype=jnp.float32)
    y_big = jax.block_until_ready(layer(x_big))
    assert y_big.shape == x_big.shape and y_big.dtype == x_big.dtype
    assert jnp.allclose(y_big, lambd(x_big), atol=1e-6, rtol=1e-6)

    # Force the Pallas path on a ragged (non-128-multiple) shape to exercise
    # the lane-pad + masked-last-block + donated-slab branch.
    forced = LambdaLayer(lambd, min_pallas_bytes=0)
    x_rag = jax.random.normal(k2, (3, 5, 7, 11), dtype=jnp.float32)
    y_rag = jax.block_until_ready(forced(x_rag))
    assert y_rag.shape == x_rag.shape
    assert jnp.allclose(y_rag, lambd(x_rag), atol=1e-6, rtol=1e-6)

    # Dtype-changing lambda: output dtype derived via eval_shape.
    cast_lambd = lambda t: (t * 0.5).astype(jnp.bfloat16)
    cast_layer = LambdaLayer(cast_lambd, min_pallas_bytes=0)
    y_cast = jax.block_until_ready(cast_layer(x_big))
    assert y_cast.dtype == jnp.bfloat16 and y_cast.shape == x_big.shape
    assert jnp.allclose(y_cast.astype(jnp.float32),
                        cast_lambd(x_big).astype(jnp.float32),
                        atol=1e-2, rtol=1e-2)

    print("KERNEL_OK")
</pallas_src>

<mosaic_0001>
module attributes {stable_mosaic.version = 11 : i64} {
  func.func @kernel(%arg0: i32, %arg1: memref<512x128xf32, #tpu.memory_space<vmem>>, %arg2: memref<512x128xf32, #tpu.memory_space<vmem>>) attributes {dimension_semantics = [#tpu.dimension_semantics<parallel>], iteration_bounds = array<i64: 2>, scalar_prefetch = 0 : i64, scratch_operands = 0 : i64, tpu.core_type = #tpu.core_type<tc>, window_params = [{transform_indices = @transform_0, window_bounds = array<i64: 512, 128>}, {transform_indices = @transform_1, window_bounds = array<i64: 512, 128>}]} {
    %c0 = arith.constant 0 : index
    %c0_0 = arith.constant 0 : index
    %0 = vector.load %arg1[%c0, %c0_0] : memref<512x128xf32, #tpu.memory_space<vmem>>, vector<512x128xf32>
    %cst = arith.constant 2.000000e+00 : f32
    %1 = vector.broadcast %cst : f32 to vector<512x128xf32>
    %2 = arith.mulf %0, %1 : vector<512x128xf32>
    %c0_1 = arith.constant 0 : index
    %c0_2 = arith.constant 0 : index
    %3 = vector.load %arg2[%c0_1, %c0_2] : memref<512x128xf32, #tpu.memory_space<vmem>>, vector<512x128xf32>
    tpu.vector_store %arg2[%c0_1, %c0_2], %2 {strides = array<i32>} : memref<512x128xf32, #tpu.memory_space<vmem>>, vector<512x128xf32>,
    return
  }
  func.func @transform_0(%arg0: i32) -> (i32, i32) {
    %c0_i32 = arith.constant 0 : i32
    %c0_i32_0 = arith.constant 0 : i32
    return %arg0, %c0_i32 : i32, i32
  }
  func.func @transform_1(%arg0: i32) -> (i32, i32) {
    %c0_i32 = arith.constant 0 : i32
    %c0_i32_0 = arith.constant 0 : i32
    return %arg0, %c0_i32 : i32, i32
  }
}

</mosaic_0001>

<bundles_post_ra>
// kernel: tpu_custom_call.1
= control target key start
LH: loop header
LB: loop body
LE: loop exit
PB: predicated region body
PF: predicated region fallthrough
CT: control target
= control target key end

     0   :  { %6 = vsyncpa [#allocation3], 0  ;;  %s883_s0 = inlined_call_operand.hbm [shape: f32[1024,128], index: 0, kind: input, shape index: {}]   ;;  %s884_s1 = inlined_call_operand.hbm [shape: f32[1024,128], index: 1, kind: output, shape index: {}]  }
   0x1   :  { %8 = vsyncpa [#allocation3 + $0x1], 0 }
   0x2   :  { %9 = vsyncpa [#allocation4], 0 }
   0x3   :  { %11 = vsyncpa [#allocation4 + $0x1], 0  ;;  %s592_s6 = smov 0   ;;  %s594_s7 = smov 0  }
   0x4   :  { %s596_s8 = smov 0   ;;  %s598_s9 = smov 0  }
   0x5 LB: > { %s613_s10 = sadd.s32 4294967295, %s574_s9   ;;  %s416_s11 = sadd.s32 4294967294, %s574_s9   ;;  %s574_s9 = sphi %s598_s9, %s899_s9   ;;  %s570_s8 = sphi %s596_s8, %s898_s8   ;;  %s566_s7 = sphi %s594_s7, %s897_s7   ;;  %s562_s6 = sphi %s592_s6, %s896_s6  }
   0x6   : > { %s617_s12 = sadd.s32 1, %s574_s9   ;;  %s24_s13 = sadd.s32 1, %s570_s8 }
   0x7   : > { %s21_s14 = ssub.s32 %s574_s9, %s617_s12  ;;  %p31_p0 = scmp.ne.s32.totalorder %s570_s8, %s566_s7 }
   0x8   : > { %p22_p1 = scmp.eq.s32.totalorder %s21_s14, 0  ;;  %p32_p2 = scmp.eq.s32.totalorder %s574_s9, 0 }
   0x9   : > { %p37_p3 = scmp.ne.s32.totalorder %s566_s7, %s562_s6  ;;  %p38_p4 = scmp.eq.s32.totalorder %s613_s10, 0 }
   0xa   : > { %s629_s15 = scalar_select %p22_p1, %s570_s8, %s24_s13  }
   0xb   : > { %p631_p5 = por %p32_p2, %p31_p0  ;;  %p635_p6 = por %p38_p4, %p37_p3 }
   0xc   : > { %p61_p7 = scmp.eq.s32.totalorder %s613_s10, 1  ;;  %p67_p8 = scmp.eq.s32.totalorder %s416_s11, 1 }
   0xd   : > { %s888_s17 = scalar_select %p635_p6, 1, 0 }
   0xe   : > { %p444_p10 = scmp.lt.s32.totalorder %s574_s9, 2  ;;  %p642_p11 = por %p61_p7, %p31_p0 }
   0xf   : > { %p646_p12 = por %p67_p8, %p37_p3  ;;  %s87_s20 = sand.u32 1, %s570_s8  }
  0x10   : > { %s889_s18 = scalar_select %p642_p11, 1, 0 }
  0x11   : > { %s890_s19 = scalar_select %p646_p12, 1, 0 }
  0x12   : > { %s430_s21 = sshll.u32 %s574_s9, 13  ;;  %s419_s22 = sshll.u32 %s87_s20, 9 }
  0x13   : > { %s655_s25 = scalar_lea.hbm %s883_s0, %s430_s21  ;;  %s91_s26 = scalar_lea.vmem [#allocation2], %s419_s22 }
  0x14   : > { %s98_s27 = sshll.u32 %s91_s26, 4  ;;  %p659_p13 = pnand %p444_p10, %p631_p5  ;;  %s663_s27 = int_to_ptr.vmem [resolvable:$true] %s98_s27 }
  0x15   : > { %s665_s29 = scalar_lea.sflag [#allocation3], %s87_s20  ;;  %s482_s30 = scalar_lea.hbm %s655_s25, 8192 }
  0x16   : > { %p483_p0 = scmp.ne.s32.totalorder %s655_s25, %s482_s30  ;;  %p484_p1 = pneg %p659_p13 }
  0x17   : > { %s487_s4 = scalar_lea.hbm %s883_s0, 16384  ;;  %p488_p4 = scmp.lt.s32.totalorder %s655_s25, %s883_s0 }
  0x18   : > { %p485_p2 = pnand %p484_p1, %p483_p0  ;;  %p489_p5 = scmp.lt.s32.totalorder %s487_s4, %s482_s30 }
  0x1a   : > { %p486_p3 = pneg %p485_p2  ;;  %p490_p7 = por %p489_p5, %p488_p4 }
  0x1c   : > { %p491_p8 = pnand %p490_p7, %p486_p3 }
  0x1e   : > { %494 = shalt.err (!%p491_p8)
}
  0x1f   : > { %s495_s13 = scalar_lea.vmem %s663_s27, 8192  ;;  %s576_s14 = smov [#allocation2]  }
  0x20   : > { %p496_p10 = scmp.ne.s32.totalorder %s663_s27, %s495_s13  ;;  %s500_s16 = sshll.u32 %s576_s14, 4  ;;  %s501_s16 = int_to_ptr.vmem [resolvable:$false] %s500_s16 }
  0x21   : > { %s502_s20 = scalar_lea.vmem %s501_s16, 16384  ;;  %p503_p2 = scmp.lt.s32.totalorder %s663_s27, %s501_s16 }
  0x22   : > { %p498_p9 = pnand %p496_p10, %p484_p1  ;;  %p504_p12 = scmp.lt.s32.totalorder %s502_s20, %s495_s13 }
  0x24   : > { %p499_p0 = pneg %p498_p9  ;;  %p505_p11 = por %p504_p12, %p503_p2 }
  0x26   : > { %p506_p6 = pnand %p505_p11, %p499_p0 }
  0x28   : > { %509 = shalt.err (!%p506_p6)
}
  0x29   : > { %s577_s21 = smov 128   ;;  %s578_s22 = smov 8  }
  0x2a   : > { %439 = dma.hbm_to_vmem [thread:$0]  (!%p659_p13), %s655_s25, 8192, %s663_s27, %s665_s29, %s577_s21, %s577_s21, %s578_s22  }
  0x2b   : > { %p422_p9 = scmp.ge.s32.totalorder %s574_s9, 1  ;;  %p106_p1 = scmp.lt.s32.totalorder %s574_s9, 3 }
  0x2d   : > { %p107_p3 = pnand %p422_p9, %p106_p1 }
  0x2e   : > { %s689_s23 = sand.u32 (!%p107_p3), 1, %s566_s7   ;;  %p892_p6 = scmp.ne.s32.totalorder (!%p107_p3), %s888_s17, 0 }
  0x2f   : > { %110 = sbr.rel (%p107_p3) target bundleno = 108 (0x6c), region = 24  ;;  %s423_s24 = sshll.u32 (!%p107_p3), %s689_s23, 9 }
  0x30   : > { %s113_s26 = scalar_lea.sflag (!%p107_p3), [#allocation3], %s689_s23  ;;  %s693_s30 = scalar_lea.vmem (!%p107_p3), [#allocation2], %s423_s24 }
  0x34   : > { %553 = dma.done.wait (%p892_p6), %s113_s26, 8192  }
  0x35   : > { %555 = vsyncadd (%p892_p6), %s113_s26, 4294959104  ;;  %v137_v0 = vld [vmem:[%s693_s30] sm:$0xff]  ;;  %v138_v1 = vld [vmem:[%s693_s30 + $0x8] sm:$0xff]  ;;  %s431_s25 = sshll.u32 %s613_s10, 13  ;;  %s703_s27 = scalar_lea.vmem [#allocation5], %s423_s24 }
  0x36   : > { %v139_v2 = vld [vmem:[%s693_s30 + $0x10] sm:$0xff]  ;;  %s343_s17 = sshll.u32 %s703_s27, 4  ;;  %v201_v3 = vmul.f32 2.0, %v137_v0  ;;  %v202_v4 = vmul.f32 2.0, %v138_v1  ;;  %v140_v6 = vld [vmem:[%s693_s30 + $0x18] sm:$0xff]  ;;  %v141_v7 = vld [vmem:[%s693_s30 + $0x20] sm:$0xff]  ;;  %s829_s2 = scalar_lea.hbm %s884_s1, %s431_s25  ;;  %s833_s17 = int_to_ptr.vmem [resolvable:$true] %s343_s17 }
  0x37   : > { %v203_v5 = vmul.f32 2.0, %v139_v2  ;;  %v142_v8 = vld [vmem:[%s693_s30 + $0x28] sm:$0xff]  ;;  %v204_v9 = vmul.f32 2.0, %v140_v6  ;;  %v205_v10 = vmul.f32 2.0, %v141_v7  ;;  %v143_v12 = vld [vmem:[%s693_s30 + $0x30] sm:$0xff]  ;;  %v144_v13 = vld [vmem:[%s693_s30 + $0x38] sm:$0xff] }
  0x38   : > { %v206_v11 = vmul.f32 2.0, %v142_v8  ;;  %v145_v14 = vld [vmem:[%s693_s30 + $0x40] sm:$0xff]  ;;  %265 = vst [vmem:[%s703_s27] sm:$0xff] %v201_v3  ;;  %266 = vst [vmem:[%s703_s27 + $0x8] sm:$0xff] %v202_v4  ;;  %v207_v15 = vmul.f32 2.0, %v143_v12  ;;  %v208_v16 = vmul.f32 2.0, %v144_v13  ;;  %v146_v18 = vld [vmem:[%s693_s30 + $0x48] sm:$0xff] }
  0x39   : > { %267 = vst [vmem:[%s703_s27 + $0x10] sm:$0xff] %v203_v5  ;;  %v209_v17 = vmul.f32 2.0, %v145_v14  ;;  %v147_v19 = vld [vmem:[%s693_s30 + $0x50] sm:$0xff]  ;;  %v148_v20 = vld [vmem:[%s693_s30 + $0x58] sm:$0xff]  ;;  %268 = vst [vmem:[%s703_s27 + $0x18] sm:$0xff] %v204_v9  ;;  %v210_v21 = vmul.f32 2.0, %v146_v18 }
  0x3a   : > { %269 = vst [vmem:[%s703_s27 + $0x20] sm:$0xff] %v205_v10  ;;  %270 = vst [vmem:[%s703_s27 + $0x28] sm:$0xff] %v206_v11  ;;  %v211_v22 = vmul.f32 2.0, %v147_v19  ;;  %v212_v23 = vmul.f32 2.0, %v148_v20  ;;  %v149_v24 = vld [vmem:[%s693_s30 + $0x60] sm:$0xff]  ;;  %v150_v25 = vld [vmem:[%s693_s30 + $0x68] sm:$0xff] }
  0x3b   : > { %v151_v26 = vld [vmem:[%s693_s30 + $0x70] sm:$0xff]  ;;  %271 = vst [vmem:[%s703_s27 + $0x30] sm:$0xff] %v207_v15  ;;  %272 = vst [vmem:[%s703_s27 + $0x38] sm:$0xff] %v208_v16  ;;  %v213_v27 = vmul.f32 2.0, %v149_v24  ;;  %v214_v28 = vmul.f32 2.0, %v150_v25  ;;  %v152_v30 = vld [vmem:[%s693_s30 + $0x78] sm:$0xff] }
  0x3c   : > { %273 = vst [vmem:[%s703_s27 + $0x40] sm:$0xff] %v209_v17  ;;  %v215_v29 = vmul.f32 2.0, %v151_v26  ;;  %v153_v31 = vld [vmem:[%s693_s30 + $0x80] sm:$0xff]  ;;  %v154_v32 = vld [vmem:[%s693_s30 + $0x88] sm:$0xff]  ;;  %274 = vst [vmem:[%s703_s27 + $0x48] sm:$0xff] %v210_v21  ;;  %v216_v33 = vmul.f32 2.0, %v152_v30 }
  0x3d   : > { %275 = vst [vmem:[%s703_s27 + $0x50] sm:$0xff] %v211_v22  ;;  %276 = vst [vmem:[%s703_s27 + $0x58] sm:$0xff] %v212_v23  ;;  %v217_v34 = vmul.f32 2.0, %v153_v31  ;;  %v218_v35 = vmul.f32 2.0, %v154_v32  ;;  %v155_v36 = vld [vmem:[%s693_s30 + $0x90] sm:$0xff]  ;;  %v156_v37 = vld [vmem:[%s693_s30 + $0x98] sm:$0xff] }
  0x3e   : > { %v157_v38 = vld [vmem:[%s693_s30 + $0xa0] sm:$0xff]  ;;  %277 = vst [vmem:[%s703_s27 + $0x60] sm:$0xff] %v213_v27  ;;  %278 = vst [vmem:[%s703_s27 + $0x68] sm:$0xff] %v214_v28  ;;  %v219_v39 = vmul.f32 2.0, %v155_v36  ;;  %v220_v40 = vmul.f32 2.0, %v156_v37  ;;  %v158_v42 = vld [vmem:[%s693_s30 + $0xa8] sm:$0xff] }
  0x3f   : > { %279 = vst [vmem:[%s703_s27 + $0x70] sm:$0xff] %v215_v29  ;;  %v221_v41 = vmul.f32 2.0, %v157_v38  ;;  %v159_v43 = vld [vmem:[%s693_s30 + $0xb0] sm:$0xff]  ;;  %v160_v44 = vld [vmem:[%s693_s30 + $0xb8] sm:$0xff]  ;;  %280 = vst [vmem:[%s703_s27 + $0x78] sm:$0xff] %v216_v33  ;;  %v222_v45 = vmul.f32 2.0, %v158_v42 }
  0x40   : > { %281 = vst [vmem:[%s703_s27 + $0x80] sm:$0xff] %v217_v34  ;;  %282 = vst [vmem:[%s703_s27 + $0x88] sm:$0xff] %v218_v35  ;;  %v223_v46 = vmul.f32 2.0, %v159_v43  ;;  %v224_v47 = vmul.f32 2.0, %v160_v44  ;;  %v161_v48 = vld [vmem:[%s693_s30 + $0xc0] sm:$0xff]  ;;  %v162_v49 = vld [vmem:[%s693_s30 + $0xc8] sm:$0xff] }
  0x41   : > { %v163_v50 = vld [vmem:[%s693_s30 + $0xd0] sm:$0xff]  ;;  %283 = vst [vmem:[%s703_s27 + $0x90] sm:$0xff] %v219_v39  ;;  %284 = vst [vmem:[%s703_s27 + $0x98] sm:$0xff] %v220_v40  ;;  %v225_v51 = vmul.f32 2.0, %v161_v48  ;;  %v226_v52 = vmul.f32 2.0, %v162_v49  ;;  %v164_v54 = vld [vmem:[%s693_s30 + $0xd8] sm:$0xff] }
  0x42   : > { %285 = vst [vmem:[%s703_s27 + $0xa0] sm:$0xff] %v221_v41  ;;  %v227_v53 = vmul.f32 2.0, %v163_v50  ;;  %v165_v55 = vld [vmem:[%s693_s30 + $0xe0] sm:$0xff]  ;;  %v166_v56 = vld [vmem:[%s693_s30 + $0xe8] sm:$0xff]  ;;  %286 = vst [vmem:[%s703_s27 + $0xa8] sm:$0xff] %v222_v45  ;;  %v228_v57 = vmul.f32 2.0, %v164_v54 }
  0x43   : > { %287 = vst [vmem:[%s703_s27 + $0xb0] sm:$0xff] %v223_v46  ;;  %288 = vst [vmem:[%s703_s27 + $0xb8] sm:$0xff] %v224_v47  ;;  %v229_v58 = vmul.f32 2.0, %v165_v55  ;;  %v230_v59 = vmul.f32 2.0, %v166_v56  ;;  %v167_v60 = vld [vmem:[%s693_s30 + $0xf0] sm:$0xff]  ;;  %v168_v61 = vld [vmem:[%s693_s30 + $0xf8] sm:$0xff] }
  0x44   : > { %v169_v62 = vld [vmem:[%s693_s30 + $0x100] sm:$0xff]  ;;  %289 = vst [vmem:[%s703_s27 + $0xc0] sm:$0xff] %v225_v51  ;;  %290 = vst [vmem:[%s703_s27 + $0xc8] sm:$0xff] %v226_v52  ;;  %v231_v63 = vmul.f32 2.0, %v167_v60  ;;  %v232_v0 = vmul.f32 2.0, %v168_v61  ;;  %v170_v2 = vld [vmem:[%s693_s30 + $0x108] sm:$0xff] }
  0x45   : > { %291 = vst [vmem:[%s703_s27 + $0xd0] sm:$0xff] %v227_v53  ;;  %v233_v1 = vmul.f32 2.0, %v169_v62  ;;  %v171_v3 = vld [vmem:[%s693_s30 + $0x110] sm:$0xff]  ;;  %v172_v4 = vld [vmem:[%s693_s30 + $0x118] sm:$0xff]  ;;  %292 = vst [vmem:[%s703_s27 + $0xd8] sm:$0xff] %v228_v57  ;;  %v234_v5 = vmul.f32 2.0, %v170_v2 }
  0x46   : > { %293 = vst [vmem:[%s703_s27 + $0xe0] sm:$0xff] %v229_v58  ;;  %294 = vst [vmem:[%s703_s27 + $0xe8] sm:$0xff] %v230_v59  ;;  %v235_v6 = vmul.f32 2.0, %v171_v3  ;;  %v236_v7 = vmul.f32 2.0, %v172_v4  ;;  %v173_v8 = vld [vmem:[%s693_s30 + $0x120] sm:$0xff]  ;;  %v174_v9 = vld [vmem:[%s693_s30 + $0x128] sm:$0xff] }
  0x47   : > { %v175_v10 = vld [vmem:[%s693_s30 + $0x130] sm:$0xff]  ;;  %295 = vst [vmem:[%s703_s27 + $0xf0] sm:$0xff] %v231_v63  ;;  %296 = vst [vmem:[%s703_s27 + $0xf8] sm:$0xff] %v232_v0  ;;  %v237_v11 = vmul.f32 2.0, %v173_v8  ;;  %v238_v12 = vmul.f32 2.0, %v174_v9  ;;  %v176_v14 = vld [vmem:[%s693_s30 + $0x138] sm:$0xff] }
  0x48   : > { %297 = vst [vmem:[%s703_s27 + $0x100] sm:$0xff] %v233_v1  ;;  %v239_v13 = vmul.f32 2.0, %v175_v10  ;;  %v177_v15 = vld [vmem:[%s693_s30 + $0x140] sm:$0xff]  ;;  %v178_v16 = vld [vmem:[%s693_s30 + $0x148] sm:$0xff]  ;;  %298 = vst [vmem:[%s703_s27 + $0x108] sm:$0xff] %v234_v5  ;;  %v240_v17 = vmul.f32 2.0, %v176_v14 }
  0x49   : > { %299 = vst [vmem:[%s703_s27 + $0x110] sm:$0xff] %v235_v6  ;;  %300 = vst [vmem:[%s703_s27 + $0x118] sm:$0xff] %v236_v7  ;;  %v241_v18 = vmul.f32 2.0, %v177_v15  ;;  %v242_v19 = vmul.f32 2.0, %v178_v16  ;;  %v179_v20 = vld [vmem:[%s693_s30 + $0x150] sm:$0xff]  ;;  %v180_v21 = vld [vmem:[%s693_s30 + $0x158] sm:$0xff] }
  0x4a   : > { %v181_v22 = vld [vmem:[%s693_s30 + $0x160] sm:$0xff]  ;;  %301 = vst [vmem:[%s703_s27 + $0x120] sm:$0xff] %v237_v11  ;;  %302 = vst [vmem:[%s703_s27 + $0x128] sm:$0xff] %v238_v12  ;;  %v243_v23 = vmul.f32 2.0, %v179_v20  ;;  %v244_v24 = vmul.f32 2.0, %v180_v21  ;;  %v182_v26 = vld [vmem:[%s693_s30 + $0x168] sm:$0xff] }
  0x4b   : > { %303 = vst [vmem:[%s703_s27 + $0x130] sm:$0xff] %v239_v13  ;;  %v245_v25 = vmul.f32 2.0, %v181_v22  ;;  %v183_v27 = vld [vmem:[%s693_s30 + $0x170] sm:$0xff]  ;;  %v184_v28 = vld [vmem:[%s693_s30 + $0x178] sm:$0xff]  ;;  %304 = vst [vmem:[%s703_s27 + $0x138] sm:$0xff] %v240_v17  ;;  %v246_v29 = vmul.f32 2.0, %v182_v26 }
  0x4c   : > { %305 = vst [vmem:[%s703_s27 + $0x140] sm:$0xff] %v241_v18  ;;  %306 = vst [vmem:[%s703_s27 + $0x148] sm:$0xff] %v242_v19  ;;  %v247_v30 = vmul.f32 2.0, %v183_v27  ;;  %v248_v31 = vmul.f32 2.0, %v184_v28  ;;  %v185_v32 = vld [vmem:[%s693_s30 + $0x180] sm:$0xff]  ;;  %v186_v33 = vld [vmem:[%s693_s30 + $0x188] sm:$0xff] }
  0x4d   : > { %v187_v34 = vld [vmem:[%s693_s30 + $0x190] sm:$0xff]  ;;  %307 = vst [vmem:[%s703_s27 + $0x150] sm:$0xff] %v243_v23  ;;  %308 = vst [vmem:[%s703_s27 + $0x158] sm:$0xff] %v244_v24  ;;  %v249_v35 = vmul.f32 2.0, %v185_v32  ;;  %v250_v36 = vmul.f32 2.0, %v186_v33  ;;  %v188_v38 = vld [vmem:[%s693_s30 + $0x198] sm:$0xff] }
  0x4e   : > { %309 = vst [vmem:[%s703_s27 + $0x160] sm:$0xff] %v245_v25  ;;  %v251_v37 = vmul.f32 2.0, %v187_v34  ;;  %v189_v39 = vld [vmem:[%s693_s30 + $0x1a0] sm:$0xff]  ;;  %v190_v40 = vld [vmem:[%s693_s30 + $0x1a8] sm:$0xff]  ;;  %310 = vst [vmem:[%s703_s27 + $0x168] sm:$0xff] %v246_v29  ;;  %v252_v41 = vmul.f32 2.0, %v188_v38 }
  0x4f   : > { %311 = vst [vmem:[%s703_s27 + $0x170] sm:$0xff] %v247_v30  ;;  %312 = vst [vmem:[%s703_s27 + $0x178] sm:$0xff] %v248_v31  ;;  %v253_v42 = vmul.f32 2.0, %v189_v39  ;;  %v254_v43 = vmul.f32 2.0, %v190_v40  ;;  %v191_v44 = vld [vmem:[%s693_s30 + $0x1b0] sm:$0xff]  ;;  %v192_v45 = vld [vmem:[%s693_s30 + $0x1b8] sm:$0xff] }
  0x50   : > { %v193_v46 = vld [vmem:[%s693_s30 + $0x1c0] sm:$0xff]  ;;  %313 = vst [vmem:[%s703_s27 + $0x180] sm:$0xff] %v249_v35  ;;  %314 = vst [vmem:[%s703_s27 + $0x188] sm:$0xff] %v250_v36  ;;  %v255_v47 = vmul.f32 2.0, %v191_v44  ;;  %v256_v48 = vmul.f32 2.0, %v192_v45  ;;  %v194_v50 = vld [vmem:[%s693_s30 + $0x1c8] sm:$0xff] }
  0x51   : > { %315 = vst [vmem:[%s703_s27 + $0x190] sm:$0xff] %v251_v37  ;;  %v257_v49 = vmul.f32 2.0, %v193_v46  ;;  %v195_v51 = vld [vmem:[%s693_s30 + $0x1d0] sm:$0xff]  ;;  %v196_v52 = vld [vmem:[%s693_s30 + $0x1d8] sm:$0xff]  ;;  %316 = vst [vmem:[%s703_s27 + $0x198] sm:$0xff] %v252_v41  ;;  %v258_v53 = vmul.f32 2.0, %v194_v50 }
  0x52   : > { %317 = vst [vmem:[%s703_s27 + $0x1a0] sm:$0xff] %v253_v42  ;;  %318 = vst [vmem:[%s703_s27 + $0x1a8] sm:$0xff] %v254_v43  ;;  %v259_v54 = vmul.f32 2.0, %v195_v51  ;;  %v260_v55 = vmul.f32 2.0, %v196_v52  ;;  %v197_v56 = vld [vmem:[%s693_s30 + $0x1e0] sm:$0xff]  ;;  %v198_v57 = vld [vmem:[%s693_s30 + $0x1e8] sm:$0xff] }
  0x53   : > { %v199_v58 = vld [vmem:[%s693_s30 + $0x1f0] sm:$0xff]  ;;  %319 = vst [vmem:[%s703_s27 + $0x1b0] sm:$0xff] %v255_v47  ;;  %320 = vst [vmem:[%s703_s27 + $0x1b8] sm:$0xff] %v256_v48  ;;  %v261_v59 = vmul.f32 2.0, %v197_v56  ;;  %v262_v60 = vmul.f32 2.0, %v198_v57  ;;  %v200_v62 = vld [vmem:[%s693_s30 + $0x1f8] sm:$0xff] }
  0x54   : > { %321 = vst [vmem:[%s703_s27 + $0x1c0] sm:$0xff] %v257_v49  ;;  %v263_v61 = vmul.f32 2.0, %v199_v58  ;;  %322 = vst [vmem:[%s703_s27 + $0x1c8] sm:$0xff] %v258_v53  ;;  %v264_v63 = vmul.f32 2.0, %v200_v62  ;;  %s330_s10 = scalar_lea.sflag [#allocation4], %s689_s23  ;;  %s510_s3 = scalar_lea.vmem %s833_s17, 8192 }
  0x55   : > { %323 = vst [vmem:[%s703_s27 + $0x1d0] sm:$0xff] %v259_v54  ;;  %324 = vst [vmem:[%s703_s27 + $0x1d8] sm:$0xff] %v260_v55  ;;  %p511_p11 = scmp.ne.s32.totalorder %s833_s17, %s510_s3  ;;  %p893_p12 = scmp.ne.s32.totalorder %s889_s18, 0 }
  0x56   : > { %325 = vst [vmem:[%s703_s27 + $0x1e0] sm:$0xff] %v261_v59  ;;  %326 = vst [vmem:[%s703_s27 + $0x1e8] sm:$0xff] %v262_v60  ;;  %s579_s4 = smov [#allocation5]  }
  0x57   : > { %327 = vst [vmem:[%s703_s27 + $0x1f0] sm:$0xff] %v263_v61  ;;  %328 = vst [vmem:[%s703_s27 + $0x1f8] sm:$0xff] %v264_v63  ;;  %p512_p13 = pnand %p511_p11, %p893_p12  ;;  %s514_s5 = sshll.u32 %s579_s4, 4  ;;  %s515_s5 = int_to_ptr.vmem [resolvable:$false] %s514_s5 }
  0x58   : > { %s516_s11 = scalar_lea.vmem %s515_s5, 16384  ;;  %p517_p5 = scmp.lt.s32.totalorder %s833_s17, %s515_s5 }
  0x59   : > { %p513_p4 = pneg %p512_p13  ;;  %p518_p7 = scmp.lt.s32.totalorder %s516_s11, %s510_s3 }
  0x5b   : > { %p519_p8 = por %p518_p7, %p517_p5 }
  0x5d   : > { %p520_p10 = pnand %p519_p8, %p513_p4 }
  0x5f   : > { %523 = shalt.err (!%p520_p10)
}
  0x60   : > { %s524_s13 = scalar_lea.hbm %s829_s2, 8192  ;;  %s528_s20 = scalar_lea.hbm %s884_s1, 16384 }
  0x61   : > { %p525_p0 = scmp.ne.s32.totalorder %s829_s2, %s524_s13  ;;  %p529_p1 = scmp.lt.s32.totalorder %s829_s2, %s884_s1 }
  0x62   : > { %p530_p3 = scmp.lt.s32.totalorder %s528_s20, %s524_s13 }
  0x63   : > { %p526_p2 = pnand %p525_p0, %p893_p12 }
  0x64   : > { %p531_p6 = por %p530_p3, %p529_p1 }
  0x65   : > { %p527_p9 = pneg %p526_p2 }
  0x67   : > { %p532_p11 = pnand %p531_p6, %p527_p9 }
  0x69   : > { %535 = shalt.err (!%p532_p11)
}
  0x6a   : > { %s580_s24 = smov 128   ;;  %s581_s26 = smov 8  }
  0x6b   : > { %434 = dma.vmem_to_hbm [thread:$0]  (%p893_p12), %s833_s17, 8192, %s829_s2, %s330_s10, %s580_s24, %s580_s24, %s581_s26  }
  0x6c PF: > { %s358_s30 = sand.u32 1, %s562_s6   ;;  %p894_p13 = scmp.ne.s32.totalorder %s890_s19, 0 }
  0x6d   : > { %p895_p4 = scmp.ge.s32.totalorder %s574_s9, 2  ;;  %s359_s25 = scalar_lea.sflag [#allocation4], %s358_s30 }
  0x6f   : > { %p441_p5 = pnand %p895_p4, %p894_p13 }
  0x71   : > { %p442_p7 = pneg %p441_p5 }
  0x73   : > { %557 = dma.done.wait (%p442_p7), %s359_s25, 8192  }
  0x74   : > { %559 = vsyncadd (%p442_p7), %s359_s25, 4294959104  ;;  %p14_p8 = scmp.ge.s32.totalorder %s617_s12, 4   ;;  %s896_s6 = smov %s566_s7 }
  0x75   : > { %s897_s7 = smov %s570_s8  ;;  %s898_s8 = smov %s629_s15 }
  0x76   : > { %s899_s9 = smov %s617_s12  ;;  %16 = sbr.rel (!%p14_p8) target bundleno = 5 (0x5), region = 69 }
  0x7b   :  { %364 = vsyncpa [#allocation3], 1 }
  0x7c   :  { %366 = vsyncpa [#allocation3 + $0x1], 1 }
  0x7d   :  { %367 = vsyncpa [#allocation4], 1 }
  0x7e   :  { %369 = vsyncpa [#allocation4 + $0x1], 1 }

</bundles_post_ra>
